<compile_context>
chip_gen: v6e
topology: v6e:2x2x1
jax: 0.10.0
libtpu: 0.0.40
codegen_flags: <defaults>
</compile_context>

<pallas_src>
import functools

import jax
import jax.numpy as jnp
import numpy as np
from jax.experimental import pallas as pl
from jax.experimental.pallas import tpu as pltpu


def _matmul_stats_kernel(p_ref, w_ref, y_ref, stats_ref):
    """Pass 1: tiled matmul -> pre-activation tile + per-lane sum / sumsq."""
    acc = jnp.dot(p_ref[...], w_ref[...],
                  preferred_element_type=jnp.float32)          # MXU
    y_ref[...] = acc

    @pl.when(pl.program_id(0) == 0)
    def _():
        stats_ref[...] = jnp.zeros_like(stats_ref)

    col_sum = jnp.sum(acc, axis=0, keepdims=True)              # (1, CP)
    col_sumsq = jnp.sum(acc * acc, axis=0, keepdims=True)      # (1, CP)
    stats_ref[...] = stats_ref[...] + jnp.concatenate(
        [col_sum, col_sumsq], axis=0)                          # (2, CP)


def _bn_relu_kernel(y_ref, s_ref, t_ref, o_ref):
    """Pass 2: folded BN affine + ReLU (2 VALU ops per element)."""
    o_ref[...] = jnp.maximum(y_ref[...] * s_ref[...] + t_ref[...], 0.0)


@functools.partial(jax.jit, static_argnames=("tile_m", "use_bf16"))
def degradation_block(x_nchw, weight, bias, gamma, beta, *,
                      tile_m=256, use_bf16=False):
    """Forward of DegradationBlock. x_nchw: (N,Cin,H,W) -> (N,Cout,2H,2W).

    weight: PyTorch ConvTranspose2d layout (Cin, Cout, 4, 4); stride=2, pad=1.
    `bias` is accepted for interface parity but not applied: with training-mode
    BatchNorm the per-channel conv bias is exactly cancelled by the mean
    subtraction.
    """
    Cin, Cout, kH, kW = weight.shape
    assert (kH, kW) == (4, 4), "phase decomposition assumes kernel_size=(4,4)"
    N, _, H, W = x_nchw.shape
    OH, OW = 2 * H, 2 * W
    CP = 128                           # lane-padded matmul-N / output width
    assert 4 * Cout <= CP
    K = 9 * Cin

    # ---- glue: NHWC, 3x3-neighbourhood im2col (pixel-shuffle formulation) ----
    x_nhwc = jnp.transpose(x_nchw, (0, 2, 3, 1)).astype(jnp.float32)
    xp = jnp.pad(x_nhwc, ((0, 0), (1, 1), (1, 1), (0, 0)))
    cols = [xp[:, dy:dy + H, dx:dx + W, :]
            for dy in range(3) for dx in range(3)]
    patches = jnp.stack(cols, axis=3).reshape(N * H * W, K)   # (M, 9*Cin)

    M = N * H * W
    Mpad = ((M + tile_m - 1) // tile_m) * tile_m
    if Mpad != M:                      # zero rows: contribute 0 to sum/sumsq
        patches = jnp.pad(patches, ((0, Mpad - M), (0, 0)))

    # ---- glue: phase-packed weight (dy,dx,ci) x (ph,pw,co), kh = ph+3-2*dy ----
    wmat = jnp.zeros((3, 3, Cin, 2, 2, Cout), jnp.float32)
    for dy in range(3):
        for dx in range(3):
            for ph in range(2):
                for pw in range(2):
                    kh = ph + 3 - 2 * dy
                    kw = pw + 3 - 2 * dx
                    if 0 <= kh < 4 and 0 <= kw < 4:
                        wmat = wmat.at[dy, dx, :, ph, pw, :].set(
                            weight[:, :, kh, kw].astype(jnp.float32))
    wmat = wmat.reshape(K, 4 * Cout)
    wmat = jnp.pad(wmat, ((0, 0), (0, CP - 4 * Cout)))         # lane-dense N

    if use_bf16:                       # halve matmul-input HBM/VMEM traffic
        patches = patches.astype(jnp.bfloat16)
        wmat = wmat.astype(jnp.bfloat16)

    nm = Mpad // tile_m

    # ---- pass 1: tiled matmul + streaming per-lane BN statistics ----
    preact, stats = pl.pallas_call(
        _matmul_stats_kernel,
        out_shape=(jax.ShapeDtypeStruct((Mpad, CP), jnp.float32),
                   jax.ShapeDtypeStruct((2, CP), jnp.float32)),
        grid=(nm,),
        in_specs=[
            pl.BlockSpec((tile_m, K), lambda i: (i, 0)),
            pl.BlockSpec((K, CP), lambda i: (0, 0)),
        ],
        out_specs=(
            pl.BlockSpec((tile_m, CP), lambda i: (i, 0)),
            pl.BlockSpec((2, CP), lambda i: (0, 0)),   # resident accumulator
        ),
        compiler_params=pltpu.CompilerParams(
            dimension_semantics=("arbitrary",),        # carries the reduction
            vmem_limit_bytes=32 * 1024 * 1024),
    )(patches, wmat)

    # ---- glue: fold BN affine per channel (reduce the 4 phase lane-groups) ----
    count = jnp.float32(N * OH * OW)
    ch_sum = jnp.sum(stats[0, :4 * Cout].reshape(4, Cout), axis=0)
    ch_sumsq = jnp.sum(stats[1, :4 * Cout].reshape(4, Cout), axis=0)
    mean = ch_sum / count
    var = ch_sumsq / count - mean * mean               # biased variance
    s = gamma.astype(jnp.float32) * jax.lax.rsqrt(var + 1e-5)
    t = beta.astype(jnp.float32) - mean * s            # conv bias cancelled
    s_lanes = jnp.pad(jnp.tile(s, 4), (0, CP - 4 * Cout)).reshape(1, CP)
    t_lanes = jnp.pad(jnp.tile(t, 4), (0, CP - 4 * Cout)).reshape(1, CP)

    # ---- pass 2: normalize + affine + ReLU (parallel over M -> 2 TCs on v7x) --
    out2d = pl.pallas_call(
        _bn_relu_kernel,
        out_shape=jax.ShapeDtypeStruct((Mpad, CP), jnp.float32),
        grid=(nm,),
        in_specs=[
            pl.BlockSpec((tile_m, CP), lambda i: (i, 0)),
            pl.BlockSpec((1, CP), lambda i: (0, 0)),
            pl.BlockSpec((1, CP), lambda i: (0, 0)),
        ],
        out_specs=pl.BlockSpec((tile_m, CP), lambda i: (i, 0)),
        compiler_params=pltpu.CompilerParams(
            dimension_semantics=("parallel",),
            vmem_limit_bytes=32 * 1024 * 1024),
    )(preact, s_lanes, t_lanes)

    # ---- glue: de-interleave phases (pixel shuffle) and return NCHW ----
    out = out2d[:M, :4 * Cout].reshape(N, H, W, 2, 2, Cout)
    out = jnp.transpose(out, (0, 1, 3, 2, 4, 5)).reshape(N, OH, OW, Cout)
    return jnp.transpose(out, (0, 3, 1, 2))


def _reference(x_nchw, weight, bias, gamma, beta, stride=2, padding=1):
    """Pure-JAX reference (lax.conv_general_dilated) for correctness check."""
    Cin, Cout, kH, kW = weight.shape
    rhs = jnp.transpose(weight[:, :, ::-1, ::-1], (1, 0, 2, 3))  # (Cout,Cin,kH,kW)
    pd = kH - 1 - padding
    y = jax.lax.conv_general_dilated(
        x_nchw, rhs, window_strides=(1, 1),
        padding=[(pd, pd), (pd, pd)], lhs_dilation=(stride, stride),
        dimension_numbers=("NCHW", "OIHW", "NCHW"))
    y = y + bias.reshape(1, Cout, 1, 1)
    mean = jnp.mean(y, axis=(0, 2, 3), keepdims=True)
    var = jnp.mean((y - mean) ** 2, axis=(0, 2, 3), keepdims=True)
    y = (y - mean) * jax.lax.rsqrt(var + 1e-5)
    y = y * gamma.reshape(1, Cout, 1, 1) + beta.reshape(1, Cout, 1, 1)
    return jnp.maximum(y, 0.0)


if __name__ == "__main__":
    key = jax.random.PRNGKey(0)
    key_x, key_w, key_b, key_g, key_be = jax.random.split(key, 5)

    N, Cin, H, W = 2, 4, 16, 16
    Cout = 8

    x = jax.random.normal(key_x, (N, Cin, H, W), jnp.float32)
    # PyTorch ConvTranspose2d weight layout: (in_channels, out_channels, kH, kW)
    weight = 0.1 * jax.random.normal(key_w, (Cin, Cout, 4, 4), jnp.float32)
    bias = 0.1 * jax.random.normal(key_b, (Cout,), jnp.float32)
    gamma = 1.0 + 0.1 * jax.random.normal(key_g, (Cout,), jnp.float32)
    beta = 0.1 * jax.random.normal(key_be, (Cout,), jnp.float32)

    out = degradation_block(x, weight, bias, gamma, beta)
    out = jax.block_until_ready(out)
    assert out.shape == (N, Cout, 2 * H, 2 * W), out.shape

    ref = _reference(x, weight, bias, gamma, beta)
    np.testing.assert_allclose(np.asarray(out), np.asarray(ref),
                               rtol=2e-4, atol=2e-4)
    print("KERNEL_OK")
</pallas_src>

<mosaic_0001>
module attributes {stable_mosaic.version = 11 : i64} {
  func.func @_matmul_stats_kernel(%arg0: i32, %arg1: memref<256x36xf32, #tpu.memory_space<vmem>>, %arg2: memref<36x128xf32, #tpu.memory_space<vmem>>, %arg3: memref<256x128xf32, #tpu.memory_space<vmem>>, %arg4: memref<2x128xf32, #tpu.memory_space<vmem>>) attributes {dimension_semantics = [#tpu.dimension_semantics<arbitrary>], iteration_bounds = array<i64: 2>, scalar_prefetch = 0 : i64, scratch_operands = 0 : i64, tpu.core_type = #tpu.core_type<tc>, window_params = [{transform_indices = @transform_0, window_bounds = array<i64: 256, 36>}, {pipeline_mode = #tpu.pipeline_mode<synchronous>, transform_indices = @transform_1, window_bounds = array<i64: 36, 128>}, {transform_indices = @transform_2, window_bounds = array<i64: 256, 128>}, {pipeline_mode = #tpu.pipeline_mode<synchronous>, transform_indices = @transform_3, window_bounds = array<i64: 2, 128>}]} {
    %c0 = arith.constant 0 : index
    %c0_0 = arith.constant 0 : index
    %0 = vector.load %arg1[%c0, %c0_0] : memref<256x36xf32, #tpu.memory_space<vmem>>, vector<256x36xf32>
    %c0_1 = arith.constant 0 : index
    %c0_2 = arith.constant 0 : index
    %1 = vector.load %arg2[%c0_1, %c0_2] : memref<36x128xf32, #tpu.memory_space<vmem>>, vector<36x128xf32>
    %cst = arith.constant dense<0.000000e+00> : vector<256x128xf32>
    %2 = tpu.matmul %0, %1, %cst {dimension_numbers = #tpu.dot_dimension_numbers<[1], [0], [0], [1], [0, 0, 1, 1], [], []>} : vector<256x36xf32>, vector<36x128xf32>, vector<256x128xf32> -> vector<256x128xf32>
    %c0_3 = arith.constant 0 : index
    %c0_4 = arith.constant 0 : index
    %3 = vector.load %arg3[%c0_3, %c0_4] : memref<256x128xf32, #tpu.memory_space<vmem>>, vector<256x128xf32>
    tpu.vector_store %arg3[%c0_3, %c0_4], %2 {strides = array<i32>} : memref<256x128xf32, #tpu.memory_space<vmem>>, vector<256x128xf32>,
    %c0_i32 = arith.constant 0 : i32
    %4 = arith.cmpi eq, %arg0, %c0_i32 : i32
    %5 = arith.extui %4 : i1 to i32
    %c0_i32_5 = arith.constant 0 : i32
    %6 = arith.cmpi ne, %5, %c0_i32_5 : i32
    scf.if %6 {
      %cst_12 = arith.constant 0.000000e+00 : f32
      %16 = vector.broadcast %cst_12 : f32 to vector<2x128xf32>
      %c0_13 = arith.constant 0 : index
      %c0_14 = arith.constant 0 : index
      %17 = vector.load %arg4[%c0_13, %c0_14] : memref<2x128xf32, #tpu.memory_space<vmem>>, vector<2x128xf32>
      tpu.vector_store %arg4[%c0_13, %c0_14], %16 {strides = array<i32>} : memref<2x128xf32, #tpu.memory_space<vmem>>, vector<2x128xf32>,
    } else {
    }
    %cst_6 = arith.constant dense<0.000000e+00> : vector<128xf32>
    %7 = vector.multi_reduction <add>, %2, %cst_6 [0] : vector<256x128xf32> to vector<128xf32>
    %8 = vector.shape_cast %7 : vector<128xf32> to vector<1x128xf32>
    %9 = arith.mulf %2, %2 : vector<256x128xf32>
    %cst_7 = arith.constant dense<0.000000e+00> : vector<128xf32>
    %10 = vector.multi_reduction <add>, %9, %cst_7 [0] : vector<256x128xf32> to vector<128xf32>
    %11 = vector.shape_cast %10 : vector<128xf32> to vector<1x128xf32>
    %c0_8 = arith.constant 0 : index
    %c0_9 = arith.constant 0 : index
    %12 = vector.load %arg4[%c0_8, %c0_9] : memref<2x128xf32, #tpu.memory_space<vmem>>, vector<2x128xf32>
    %13 = tpu.concatenate %8, %11 in 0 : vector<1x128xf32>, vector<1x128xf32> -> vector<2x128xf32>
    %14 = arith.addf %12, %13 : vector<2x128xf32>
    %c0_10 = arith.constant 0 : index
    %c0_11 = arith.constant 0 : index
    %15 = vector.load %arg4[%c0_10, %c0_11] : memref<2x128xf32, #tpu.memory_space<vmem>>, vector<2x128xf32>
    tpu.vector_store %arg4[%c0_10, %c0_11], %14 {strides = array<i32>} : memref<2x128xf32, #tpu.memory_space<vmem>>, vector<2x128xf32>,
    return
  }
  func.func @transform_0(%arg0: i32) -> (i32, i32) {
    %c0_i32 = arith.constant 0 : i32
    %c0_i32_0 = arith.constant 0 : i32
    return %arg0, %c0_i32 : i32, i32
  }
  func.func @transform_1(%arg0: i32) -> (i32, i32) {
    %c0_i32 = arith.constant 0 : i32
    %c0_i32_0 = arith.constant 0 : i32
    %c0_i32_1 = arith.constant 0 : i32
    return %c0_i32, %c0_i32_0 : i32, i32
  }
  func.func @transform_2(%arg0: i32) -> (i32, i32) {
    %c0_i32 = arith.constant 0 : i32
    %c0_i32_0 = arith.constant 0 : i32
    return %arg0, %c0_i32 : i32, i32
  }
  func.func @transform_3(%arg0: i32) -> (i32, i32) {
    %c0_i32 = arith.constant 0 : i32
    %c0_i32_0 = arith.constant 0 : i32
    %c0_i32_1 = arith.constant 0 : i32
    return %c0_i32, %c0_i32_0 : i32, i32
  }
}

module attributes {stable_mosaic.version = 11 : i64} {
  func.func @_bn_relu_kernel(%arg0: i32, %arg1: memref<256x128xf32, #tpu.memory_space<vmem>>, %arg2: memref<1x128xf32, #tpu.memory_space<vmem>>, %arg3: memref<1x128xf32, #tpu.memory_space<vmem>>, %arg4: memref<256x128xf32, #tpu.memory_space<vmem>>) attributes {dimension_semantics = [#tpu.dimension_semantics<parallel>], iteration_bounds = array<i64: 2>, scalar_prefetch = 0 : i64, scratch_operands = 0 : i64, tpu.core_type = #tpu.core_type<tc>, window_params = [{transform_indices = @transform_0, window_bounds = array<i64: 256, 128>}, {pipeline_mode = #tpu.pipeline_mode<synchronous>, transform_indices = @transform_1, window_bounds = array<i64: 1, 128>}, {pipeline_mode = #tpu.pipeline_mode<synchronous>, transform_indices = @transform_2, window_bounds = array<i64: 1, 128>}, {transform_indices = @transform_3, window_bounds = array<i64: 256, 128>}]} {
    %c0 = arith.constant 0 : index
    %c0_0 = arith.constant 0 : index
    %0 = vector.load %arg1[%c0, %c0_0] : memref<256x128xf32, #tpu.memory_space<vmem>>, vector<256x128xf32>
    %c0_1 = arith.constant 0 : index
    %c0_2 = arith.constant 0 : index
    %1 = vector.load %arg2[%c0_1, %c0_2] : memref<1x128xf32, #tpu.memory_space<vmem>>, vector<1x128xf32>
    %2 = vector.broadcast %1 : vector<1x128xf32> to vector<256x128xf32>
    %3 = arith.mulf %0, %2 : vector<256x128xf32>
    %c0_3 = arith.constant 0 : index
    %c0_4 = arith.constant 0 : index
    %4 = vector.load %arg3[%c0_3, %c0_4] : memref<1x128xf32, #tpu.memory_space<vmem>>, vector<1x128xf32>
    %5 = vector.broadcast %4 : vector<1x128xf32> to vector<256x128xf32>
    %6 = arith.addf %3, %5 : vector<256x128xf32>
    %cst = arith.constant 0.000000e+00 : f32
    %7 = vector.broadcast %cst : f32 to vector<256x128xf32>
    %8 = arith.maximumf %6, %7 : vector<256x128xf32>
    %c0_5 = arith.constant 0 : index
    %c0_6 = arith.constant 0 : index
    %9 = vector.load %arg4[%c0_5, %c0_6] : memref<256x128xf32, #tpu.memory_space<vmem>>, vector<256x128xf32>
    tpu.vector_store %arg4[%c0_5, %c0_6], %8 {strides = array<i32>} : memref<256x128xf32, #tpu.memory_space<vmem>>, vector<256x128xf32>,
    return
  }
  func.func @transform_0(%arg0: i32) -> (i32, i32) {
    %c0_i32 = arith.constant 0 : i32
    %c0_i32_0 = arith.constant 0 : i32
    return %arg0, %c0_i32 : i32, i32
  }
  func.func @transform_1(%arg0: i32) -> (i32, i32) {
    %c0_i32 = arith.constant 0 : i32
    %c0_i32_0 = arith.constant 0 : i32
    %c0_i32_1 = arith.constant 0 : i32
    return %c0_i32, %c0_i32_0 : i32, i32
  }
  func.func @transform_2(%arg0: i32) -> (i32, i32) {
    %c0_i32 = arith.constant 0 : i32
    %c0_i32_0 = arith.constant 0 : i32
    %c0_i32_1 = arith.constant 0 : i32
    return %c0_i32, %c0_i32_0 : i32, i32
  }
  func.func @transform_3(%arg0: i32) -> (i32, i32) {
    %c0_i32 = arith.constant 0 : i32
    %c0_i32_0 = arith.constant 0 : i32
    return %arg0, %c0_i32 : i32, i32
  }
}

</mosaic_0001>

<bundles_post_ra>
// kernel: squeeze.34
= control target key start
LH: loop header
LB: loop body
LE: loop exit
PB: predicated region body
PF: predicated region fallthrough
CT: control target
= control target key end

     0   :  { %s40_s8 = smov 104   ;;  %vm8_vm0 = vcmask 64512   ;;  %s41_s9 = smov 112   ;;  %s58_s0 = inlined_call_operand.vmem [shape: f32[32], index: 0, kind: input, shape index: {}]   ;;  %s59_s1 = inlined_call_operand.vmem [shape: f32[4,8], index: 1, kind: output, shape index: {}]  }
   0x1   :  { %v5_v0 = vld [vmem:[%s58_s0] sm:$0x1]  ;;  %s39_s0 = smov 120  }
   0x2   :  { %6 = vst [vmem:[#allocation1] sm:$0x1] %v5_v0 }
   0x9   :  { %v10_v1 = vld [vmem:[#allocation1] sm:$0x1]  }
   0xa   :  { %v22_v2 = vld [vmem:[#allocation1] sm:$0x1]   ;;  %11 = vrot.lane.b32.xlu0 %v10_v1, %s39_s0 }
   0xb   :  { %23 = vrot.lane.b32.xlu1 %v22_v2, %s40_s8  ;;  %v7_v3 = vld [vmem:[#allocation1] sm:$0x1]  }
   0xc   :  { %v16_v4 = vld [vmem:[#allocation1] sm:$0x1]   ;;  %9 = vst.msk [vmem:[#allocation0] sm:$0x1] %vm8_vm0, %v7_v3  }
   0xe   :  { %17 = vrot.lane.b32.xlu0 %v16_v4, %s41_s9 }
  0x7c   :  { %v12_v5 = vpop.permute.xlu0 %11  }
  0x7d   :  { %v24_v6 = vpop.permute.xlu1 %23   ;;  %15 = vst.msk [vmem:[#allocation0 + $0x1] sm:$0x1] %vm8_vm0, %v12_v5  }
  0x7e   :  { %27 = vst.msk [vmem:[#allocation0 + $0x3] sm:$0x1] %vm8_vm0, %v24_v6  }
  0x80   :  { %v18_v7 = vpop.permute.xlu0 %17  }
  0x81   :  { %21 = vst.msk [vmem:[#allocation0 + $0x2] sm:$0x1] %vm8_vm0, %v18_v7  }
  0x88   :  { %v32_v8 = vld [vmem:[#allocation0] sm:$0xf] }
  0x89   :  { %35 = vst [vmem:[%s59_s1] sm:$0xf] %v32_v8 }

// kernel: tile.18
= control target key start
LH: loop header
LB: loop body
LE: loop exit
PB: predicated region body
PF: predicated region fallthrough
CT: control target
= control target key end

     0   :  { %s22_s0 = inlined_call_operand.vmem [shape: f32[8], index: 0, kind: input, shape index: {}]   ;;  %s23_s1 = inlined_call_operand.vmem [shape: f32[4,8], index: 1, kind: output, shape index: {}]  }
   0x1   :  { %v4_v0 = vld [vmem:[%s22_s0] ss:$0 sm:$0xff] }
   0x2   :  { %5 = vst [vmem:[%s23_s1] sm:$0xf] %v4_v0 }

// kernel: tile.19
= control target key start
LH: loop header
LB: loop body
LE: loop exit
PB: predicated region body
PF: predicated region fallthrough
CT: control target
= control target key end

     0   :  { %vm8_vm0 = vcmask 64512   ;;  %s40_s8 = smov 8   ;;  %s41_s9 = smov 16   ;;  %vm14_vm1 = vcmask 261312   ;;  %vm20_vm2 = vcmask 195712   ;;  %vm26_vm3 = vcmask 130112   ;;  %s58_s0 = inlined_call_operand.vmem [shape: f32[4,8], index: 0, kind: input, shape index: {}]   ;;  %s59_s1 = inlined_call_operand.vmem [shape: f32[32], index: 1, kind: output, shape index: {}]  }
   0x1   :  { %v5_v0 = vld [vmem:[%s58_s0] sm:$0xf]  ;;  %s39_s0 = smov 24  }
   0x2   :  { %6 = vst [vmem:[#allocation1] sm:$0xf] %v5_v0 }
   0x9   :  { %v11_v1 = vld [vmem:[#allocation1 + $0x3] sm:$0x1]   ;;  %v23_v2 = vld [vmem:[#allocation1 + $0x1] sm:$0x1]   ;;  %v7_v3 = vld [vmem:[#allocation1] sm:$0x1]  }
   0xa   :  { %12 = vrot.lane.b32.xlu0 %v11_v1, %s39_s0  ;;  %24 = vrot.lane.b32.xlu1 %v23_v2, %s40_s8  ;;  %v17_v4 = vld [vmem:[#allocation1 + $0x2] sm:$0x1]   ;;  %9 = vst.msk [vmem:[#allocation0] sm:$0x1] %vm8_vm0, %v7_v3  }
   0xe   :  { %18 = vrot.lane.b32.xlu0 %v17_v4, %s41_s9 }
  0x7c   :  { %v13_v5 = vpop.permute.xlu0 %12   ;;  %v25_v6 = vpop.permute.xlu1 %24  }
  0x7d   :  { %15 = vst.msk [vmem:[#allocation0] sm:$0x1] %vm14_vm1, %v13_v5  }
  0x80   :  { %v19_v7 = vpop.permute.xlu0 %18  }
  0x81   :  { %21 = vst.msk [vmem:[#allocation0] sm:$0x1] %vm20_vm2, %v19_v7  }
  0x82   :  { %27 = vst.msk [vmem:[#allocation0] sm:$0x1] %vm26_vm3, %v25_v6  }
  0x89   :  { %v32_v8 = vld [vmem:[#allocation0] sm:$0x1] }
  0x8a   :  { %35 = vst [vmem:[%s59_s1] sm:$0x1] %v32_v8 }

// kernel: degradation_block.3
= control target key start
LH: loop header
LB: loop body
LE: loop exit
PB: predicated region body
PF: predicated region fallthrough
CT: control target
= control target key end

     0   :  { %s453_s12 = smov 0   ;;  %s612_s0 = inlined_call_operand.vmem [shape: f32[512,128], index: 0, kind: input, shape index: {}]   ;;  %s613_s1 = inlined_call_operand.vmem [shape: f32[1,128], index: 1, kind: input, shape index: {}]   ;;  %s614_s2 = inlined_call_operand.vmem [shape: f32[1,128], index: 2, kind: input, shape index: {}]   ;;  %s615_s3 = inlined_call_operand.vmem [shape: f32[512,128], index: 3, kind: output, shape index: {}]  }
   0x1 LB: > { %s404_s13 = sadd.s32 4294967295, %s431_s12   ;;  %p408_p0 = scmp.ge.s32.totalorder %s431_s12, 1  ;;  %s431_s12 = sphi %s453_s12, %s13_s12  }
   0x2   : > { %p138_p1 = scmp.lt.s32.totalorder %s431_s12, 3 }
   0x4   : > { %p139_p2 = pnand %p408_p0, %p138_p1 }
   0x5   : > { %s409_s14 = sshll.u32 (!%p139_p2), %s404_s13, 5 }
   0x6   : > { %142 = sbr.rel (%p139_p2) target bundleno = 44 (0x2c), region = 32  ;;  %p163_p3 = scmp.lt.s32.totalorder (!%p139_p2), %s409_s14, 63 }
   0xb   : > { %s617_s14 = smov (!%p163_p3, %s409_s14), 63  ;;  %v464_v0 = vld [vmem:[%s613_s1] ss:$0 sm:$0xff] }
   0xc   : > { %s410_s15 = sshll.u32 %s617_s14, 3  ;;  %v474_v1 = vld [vmem:[%s614_s2] ss:$0 sm:$0xff] }
   0xd   : > { %s469_s20 = scalar_lea.vmem %s612_s0, %s410_s15  ;;  %s497_s25 = scalar_lea.vmem %s615_s3, %s410_s15 }
   0xe   : > { %v174_v2 = vld [vmem:[%s469_s20] sm:$0xff]  ;;  %v175_v3 = vld [vmem:[%s469_s20 + $0x8] sm:$0xff]  ;;  %v176_v4 = vld [vmem:[%s469_s20 + $0x10] sm:$0xff] }
   0xf   : > { %v213_v5 = vmul.f32 %v464_v0, %v174_v2  ;;  %v214_v6 = vmul.f32 %v464_v0, %v175_v3  ;;  %v215_v7 = vmul.f32 %v464_v0, %v176_v4  ;;  %v177_v8 = vld [vmem:[%s469_s20 + $0x18] sm:$0xff]  ;;  %v178_v9 = vld [vmem:[%s469_s20 + $0x20] sm:$0xff]  ;;  %v179_v10 = vld [vmem:[%s469_s20 + $0x28] sm:$0xff] }
  0x10   : > { %v216_v11 = vmul.f32 %v464_v0, %v177_v8  ;;  %v217_v12 = vmul.f32 %v464_v0, %v178_v9  ;;  %v218_v13 = vmul.f32 %v464_v0, %v179_v10  ;;  %v180_v14 = vld [vmem:[%s469_s20 + $0x30] sm:$0xff]  ;;  %v181_v15 = vld [vmem:[%s469_s20 + $0x38] sm:$0xff]  ;;  %v182_v24 = vld [vmem:[%s469_s20 + $0x40] sm:$0xff] }
  0x11   : > { %v252_v16 = vadd.f32 %v474_v1, %v213_v5  ;;  %v253_v17 = vadd.f32 %v474_v1, %v214_v6  ;;  %v254_v18 = vadd.f32 %v474_v1, %v215_v7  ;;  %v219_v19 = vmul.f32 %v464_v0, %v180_v14  ;;  %v183_v25 = vld [vmem:[%s469_s20 + $0x48] sm:$0xff]  ;;  %v184_v26 = vld [vmem:[%s469_s20 + $0x50] sm:$0xff]  ;;  %v185_v31 = vld [vmem:[%s469_s20 + $0x58] sm:$0xff] }
  0x12   : > { %v255_v20 = vadd.f32 %v474_v1, %v216_v11  ;;  %v256_v21 = vadd.f32 %v474_v1, %v217_v12  ;;  %v257_v22 = vadd.f32 %v474_v1, %v218_v13  ;;  %v220_v23 = vmul.f32 %v464_v0, %v181_v15  ;;  %v186_v32 = vld [vmem:[%s469_s20 + $0x60] sm:$0xff]  ;;  %v187_v33 = vld [vmem:[%s469_s20 + $0x68] sm:$0xff]  ;;  %v188_v38 = vld [vmem:[%s469_s20 + $0x70] sm:$0xff] }
  0x13   : > { %v284_v27 = vmax.f32 %v252_v16, 0.0  ;;  %v285_v28 = vmax.f32 %v253_v17, 0.0  ;;  %v286_v29 = vmax.f32 %v254_v18, 0.0  ;;  %v258_v30 = vadd.f32 %v474_v1, %v219_v19  ;;  %v189_v43 = vld [vmem:[%s469_s20 + $0x78] sm:$0xff]  ;;  %v190_v56 = vld [vmem:[%s469_s20 + $0x80] sm:$0xff]  ;;  %v191_v57 = vld [vmem:[%s469_s20 + $0x88] sm:$0xff] }
  0x14   : > { %v287_v34 = vmax.f32 %v255_v20, 0.0  ;;  %v288_v35 = vmax.f32 %v256_v21, 0.0  ;;  %v289_v36 = vmax.f32 %v257_v22, 0.0  ;;  %v259_v37 = vadd.f32 %v474_v1, %v220_v23  ;;  %v192_v58 = vld [vmem:[%s469_s20 + $0x90] sm:$0xff]  ;;  %v193_v63 = vld [vmem:[%s469_s20 + $0x98] sm:$0xff]  ;;  %v194_v2 = vld [vmem:[%s469_s20 + $0xa0] sm:$0xff] }
  0x15   : > { %316 = vst [vmem:[%s497_s25] sm:$0xff] %v284_v27  ;;  %317 = vst [vmem:[%s497_s25 + $0x8] sm:$0xff] %v285_v28  ;;  %v290_v39 = vmax.f32 %v258_v30, 0.0  ;;  %v221_v40 = vmul.f32 %v464_v0, %v182_v24  ;;  %v222_v41 = vmul.f32 %v464_v0, %v183_v25  ;;  %v223_v42 = vmul.f32 %v464_v0, %v184_v26  ;;  %v195_v3 = vld [vmem:[%s469_s20 + $0xa8] sm:$0xff]  ;;  %v196_v8 = vld [vmem:[%s469_s20 + $0xb0] sm:$0xff] }
  0x16   : > { %318 = vst [vmem:[%s497_s25 + $0x10] sm:$0xff] %v286_v29  ;;  %319 = vst [vmem:[%s497_s25 + $0x18] sm:$0xff] %v287_v34  ;;  %v291_v44 = vmax.f32 %v259_v37, 0.0  ;;  %v224_v45 = vmul.f32 %v464_v0, %v185_v31  ;;  %v225_v46 = vmul.f32 %v464_v0, %v186_v32  ;;  %v226_v47 = vmul.f32 %v464_v0, %v187_v33  ;;  %v197_v13 = vld [vmem:[%s469_s20 + $0xb8] sm:$0xff]  ;;  %v198_v26 = vld [vmem:[%s469_s20 + $0xc0] sm:$0xff] }
  0x17   : > { %320 = vst [vmem:[%s497_s25 + $0x20] sm:$0xff] %v288_v35  ;;  %321 = vst [vmem:[%s497_s25 + $0x28] sm:$0xff] %v289_v36  ;;  %v260_v48 = vadd.f32 %v474_v1, %v221_v40  ;;  %v261_v49 = vadd.f32 %v474_v1, %v222_v41  ;;  %v262_v50 = vadd.f32 %v474_v1, %v223_v42  ;;  %v199_v27 = vld [vmem:[%s469_s20 + $0xc8] sm:$0xff]  ;;  %v200_v28 = vld [vmem:[%s469_s20 + $0xd0] sm:$0xff] }
  0x18   : > { %322 = vst [vmem:[%s497_s25 + $0x30] sm:$0xff] %v290_v39  ;;  %v227_v51 = vmul.f32 %v464_v0, %v188_v38  ;;  %323 = vst [vmem:[%s497_s25 + $0x38] sm:$0xff] %v291_v44  ;;  %v263_v52 = vadd.f32 %v474_v1, %v224_v45  ;;  %v264_v53 = vadd.f32 %v474_v1, %v225_v46  ;;  %v201_v33 = vld [vmem:[%s469_s20 + $0xd8] sm:$0xff]  ;;  %v202_v34 = vld [vmem:[%s469_s20 + $0xe0] sm:$0xff] }
  0x19   : > { %v265_v54 = vadd.f32 %v474_v1, %v226_v47  ;;  %v228_v55 = vmul.f32 %v464_v0, %v189_v43  ;;  %v292_v59 = vmax.f32 %v260_v48, 0.0  ;;  %v293_v60 = vmax.f32 %v261_v49, 0.0  ;;  %v203_v35 = vld [vmem:[%s469_s20 + $0xe8] sm:$0xff]  ;;  %v204_v40 = vld [vmem:[%s469_s20 + $0xf0] sm:$0xff]  ;;  %v205_v45 = vld [vmem:[%s469_s20 + $0xf8] sm:$0xff] }
  0x1a   : > { %v294_v61 = vmax.f32 %v262_v50, 0.0  ;;  %v266_v62 = vadd.f32 %v474_v1, %v227_v51  ;;  %v295_v4 = vmax.f32 %v263_v52, 0.0  ;;  %v296_v5 = vmax.f32 %v264_v53, 0.0 }
  0x1b   : > { %v297_v6 = vmax.f32 %v265_v54, 0.0  ;;  %v267_v7 = vadd.f32 %v474_v1, %v228_v55  ;;  %324 = vst [vmem:[%s497_s25 + $0x40] sm:$0xff] %v292_v59  ;;  %325 = vst [vmem:[%s497_s25 + $0x48] sm:$0xff] %v293_v60  ;;  %v229_v10 = vmul.f32 %v464_v0, %v190_v56  ;;  %v230_v11 = vmul.f32 %v464_v0, %v191_v57 }
  0x1c   : > { %326 = vst [vmem:[%s497_s25 + $0x50] sm:$0xff] %v294_v61  ;;  %v298_v9 = vmax.f32 %v266_v62, 0.0  ;;  %v231_v12 = vmul.f32 %v464_v0, %v192_v58  ;;  %327 = vst [vmem:[%s497_s25 + $0x58] sm:$0xff] %v295_v4  ;;  %v232_v15 = vmul.f32 %v464_v0, %v193_v63  ;;  %v233_v16 = vmul.f32 %v464_v0, %v194_v2 }
  0x1d   : > { %328 = vst [vmem:[%s497_s25 + $0x60] sm:$0xff] %v296_v5  ;;  %329 = vst [vmem:[%s497_s25 + $0x68] sm:$0xff] %v297_v6  ;;  %v299_v14 = vmax.f32 %v267_v7, 0.0  ;;  %v234_v17 = vmul.f32 %v464_v0, %v195_v3  ;;  %v268_v18 = vadd.f32 %v474_v1, %v229_v10  ;;  %v269_v19 = vadd.f32 %v474_v1, %v230_v11 }
  0x1e   : > { %330 = vst [vmem:[%s497_s25 + $0x70] sm:$0xff] %v298_v9  ;;  %v270_v20 = vadd.f32 %v474_v1, %v231_v12  ;;  %v235_v21 = vmul.f32 %v464_v0, %v196_v8  ;;  %v271_v22 = vadd.f32 %v474_v1, %v232_v15  ;;  %v272_v23 = vadd.f32 %v474_v1, %v233_v16 }
  0x1f   : > { %331 = vst [vmem:[%s497_s25 + $0x78] sm:$0xff] %v299_v14  ;;  %v273_v24 = vadd.f32 %v474_v1, %v234_v17  ;;  %v236_v25 = vmul.f32 %v464_v0, %v197_v13  ;;  %v300_v29 = vmax.f32 %v268_v18, 0.0  ;;  %v301_v30 = vmax.f32 %v269_v19, 0.0 }
  0x20   : > { %v302_v31 = vmax.f32 %v270_v20, 0.0  ;;  %v274_v32 = vadd.f32 %v474_v1, %v235_v21  ;;  %v303_v36 = vmax.f32 %v271_v22, 0.0  ;;  %v304_v37 = vmax.f32 %v272_v23, 0.0 }
  0x21   : > { %v305_v38 = vmax.f32 %v273_v24, 0.0  ;;  %v275_v39 = vadd.f32 %v474_v1, %v236_v25  ;;  %332 = vst [vmem:[%s497_s25 + $0x80] sm:$0xff] %v300_v29  ;;  %333 = vst [vmem:[%s497_s25 + $0x88] sm:$0xff] %v301_v30  ;;  %v237_v42 = vmul.f32 %v464_v0, %v198_v26  ;;  %v238_v43 = vmul.f32 %v464_v0, %v199_v27 }
  0x22   : > { %334 = vst [vmem:[%s497_s25 + $0x90] sm:$0xff] %v302_v31  ;;  %v306_v41 = vmax.f32 %v274_v32, 0.0  ;;  %v239_v44 = vmul.f32 %v464_v0, %v200_v28  ;;  %335 = vst [vmem:[%s497_s25 + $0x98] sm:$0xff] %v303_v36  ;;  %v240_v47 = vmul.f32 %v464_v0, %v201_v33  ;;  %v241_v48 = vmul.f32 %v464_v0, %v202_v34 }
  0x23   : > { %336 = vst [vmem:[%s497_s25 + $0xa0] sm:$0xff] %v304_v37  ;;  %337 = vst [vmem:[%s497_s25 + $0xa8] sm:$0xff] %v305_v38  ;;  %v307_v46 = vmax.f32 %v275_v39, 0.0  ;;  %v242_v49 = vmul.f32 %v464_v0, %v203_v35  ;;  %v276_v50 = vadd.f32 %v474_v1, %v237_v42  ;;  %v277_v51 = vadd.f32 %v474_v1, %v238_v43 }
  0x24   : > { %338 = vst [vmem:[%s497_s25 + $0xb0] sm:$0xff] %v306_v41  ;;  %v278_v52 = vadd.f32 %v474_v1, %v239_v44  ;;  %v243_v53 = vmul.f32 %v464_v0, %v204_v40  ;;  %v279_v54 = vadd.f32 %v474_v1, %v240_v47  ;;  %v280_v55 = vadd.f32 %v474_v1, %v241_v48 }
  0x25   : > { %339 = vst [vmem:[%s497_s25 + $0xb8] sm:$0xff] %v307_v46  ;;  %v281_v56 = vadd.f32 %v474_v1, %v242_v49  ;;  %v244_v57 = vmul.f32 %v464_v0, %v205_v45  ;;  %v308_v58 = vmax.f32 %v276_v50, 0.0  ;;  %v309_v59 = vmax.f32 %v277_v51, 0.0 }
  0x26   : > { %v310_v60 = vmax.f32 %v278_v52, 0.0  ;;  %v282_v61 = vadd.f32 %v474_v1, %v243_v53  ;;  %v311_v62 = vmax.f32 %v279_v54, 0.0  ;;  %v312_v63 = vmax.f32 %v280_v55, 0.0 }
  0x27   : > { %v313_v2 = vmax.f32 %v281_v56, 0.0  ;;  %v283_v3 = vadd.f32 %v474_v1, %v244_v57  ;;  %340 = vst [vmem:[%s497_s25 + $0xc0] sm:$0xff] %v308_v58  ;;  %341 = vst [vmem:[%s497_s25 + $0xc8] sm:$0xff] %v309_v59 }
  0x28   : > { %342 = vst [vmem:[%s497_s25 + $0xd0] sm:$0xff] %v310_v60  ;;  %v314_v4 = vmax.f32 %v282_v61, 0.0  ;;  %343 = vst [vmem:[%s497_s25 + $0xd8] sm:$0xff] %v311_v62 }
  0x29   : > { %344 = vst [vmem:[%s497_s25 + $0xe0] sm:$0xff] %v312_v63  ;;  %345 = vst [vmem:[%s497_s25 + $0xe8] sm:$0xff] %v313_v2  ;;  %v315_v0 = vmax.f32 %v283_v3, 0.0 }
  0x2a   : > { %346 = vst [vmem:[%s497_s25 + $0xf0] sm:$0xff] %v314_v4 }
  0x2b   : > { %347 = vst [vmem:[%s497_s25 + $0xf8] sm:$0xff] %v315_v0 }
  0x2c PF: > { %s13_s12 = sadd.s32 1, %s431_s12  }
  0x2d   : > { %p10_p4 = scmp.ge.s32.totalorder %s13_s12, 4  }
  0x2f   :  { %12 = sbr.rel (!%p10_p4) target bundleno = 1 (0x1), region = 62 }

// kernel: degradation_block.2
= control target key start
LH: loop header
LB: loop body
LE: loop exit
PB: predicated region body
PF: predicated region fallthrough
CT: control target
= control target key end

     0   :  { %s933_s12 = smov 0   ;;  %s1223_s0 = inlined_call_operand.vmem [shape: f32[512,36], index: 0, kind: input, shape index: {}]   ;;  %s1224_s1 = inlined_call_operand.vmem [shape: f32[36,128], index: 1, kind: input, shape index: {}]   ;;  %s1225_s2 = inlined_call_operand.vmem [shape: f32[512,128], index: 2, kind: output, shape index: {0}]   ;;  %s1226_s3 = inlined_call_operand.vmem [shape: f32[2,128], index: 3, kind: output, shape index: {1}]  }
   0x1 LB: > { %s745_s13 = sadd.s32 4294967295, %s910_s12   ;;  %p749_p0 = scmp.ge.s32.totalorder %s910_s12, 1  ;;  %s910_s12 = sphi %s933_s12, %s14_s12  }
   0x2   : > { %p136_p1 = scmp.lt.s32.totalorder %s910_s12, 3 }
   0x4   : > { %p137_p2 = pnand %p749_p0, %p136_p1 }
   0x5   : > { %s750_s18 = sshll.u32 (!%p137_p2), %s745_s13, 5  ;;  %p787_p4 = scmp.ne.s32.totalorder (!%p137_p2), %s745_s13, 0 }
   0x6   : > { %140 = sbr.rel (%p137_p2) target bundleno = 329 (0x149), region = 28  ;;  %p161_p3 = scmp.lt.s32.totalorder (!%p137_p2), %s750_s18, 63 }
   0xb   : > { %v208_v0 = vld [vmem:[%s1224_s1 + $0x20] sm:$0xf]  ;;  %vm306_vm0 = vcmask 1043456   ;;  %v207_v1 = vld [vmem:[%s1224_s1 + $0x18] sm:$0xff]  ;;  %v206_v2 = vld [vmem:[%s1224_s1 + $0x10] sm:$0xff]  ;;  %s1228_s18 = smov (!%p161_p3, %s750_s18), 63 }
   0xc   : > { %827 = vmatprep.subr.msk.mxu0 %vm306_vm0, %v208_v0  ;;  %885 = vmatprep.subr.msk.mxu1 %vm306_vm0, %v208_v0  ;;  %v205_v3 = vld [vmem:[%s1224_s1 + $0x8] sm:$0xff]  ;;  %s751_s23 = sshll.u32 %s1228_s18, 3  ;;  %v204_v4 = vld [vmem:[%s1224_s1] sm:$0xff]  ;;  %vm209_vm1 = vcmask 293888  }
   0xd   : > { %828 = vmatpush3.msk.msra.mxu0 %vm306_vm0, %v208_v0  ;;  %890 = vmatpush3.msk.msra.mxu1 %vm306_vm0, %v208_v0  ;;  %s966_s28 = scalar_lea.vmem %s1223_s0, %s751_s23  ;;  %s1037_s4 = scalar_lea.vmem %s1225_s2, %s751_s23 }
   0xe   : > { %829 = vmatprep.subr.mxu0 %v207_v1  ;;  %886 = vmatprep.subr.mxu1 %v207_v1  ;;  %v172_v5 = vld [vmem:[%s966_s28] sm:$0xff]  ;;  %v173_v7 = vld [vmem:[%s966_s28 + $0x8] sm:$0xff]  ;;  %v174_v9 = vld [vmem:[%s966_s28 + $0x10] sm:$0xff] }
   0xf   : > { %830 = vmatpush3.msra.mxu0 %v207_v1  ;;  %891 = vmatpush3.msra.mxu1 %v207_v1  ;;  %v188_v6 = vld [vmem:[%s966_s28 + $0x80] sm:$0xff]  ;;  %v189_v8 = vld [vmem:[%s966_s28 + $0x88] sm:$0xff]  ;;  %v190_v10 = vld [vmem:[%s966_s28 + $0x90] sm:$0xff] }
  0x10   : > { %831 = vmatprep.subr.mxu0 %v206_v2  ;;  %887 = vmatprep.subr.mxu1 %v206_v2  ;;  %v175_v11 = vld [vmem:[%s966_s28 + $0x18] sm:$0xff]  ;;  %v176_v13 = vld [vmem:[%s966_s28 + $0x20] sm:$0xff]  ;;  %v177_v15 = vld [vmem:[%s966_s28 + $0x28] sm:$0xff] }
  0x11   : > { %832 = vmatpush3.msra.mxu0 %v206_v2  ;;  %892 = vmatpush3.msra.mxu1 %v206_v2  ;;  %v191_v12 = vld [vmem:[%s966_s28 + $0x98] sm:$0xff]  ;;  %v192_v14 = vld [vmem:[%s966_s28 + $0xa0] sm:$0xff]  ;;  %v193_v16 = vld [vmem:[%s966_s28 + $0xa8] sm:$0xff] }
  0x12   : > { %833 = vmatprep.subr.mxu0 %v205_v3  ;;  %888 = vmatprep.subr.mxu1 %v205_v3  ;;  %v178_v17 = vld [vmem:[%s966_s28 + $0x30] sm:$0xff]  ;;  %v179_v19 = vld [vmem:[%s966_s28 + $0x38] sm:$0xff]  ;;  %v180_v21 = vld [vmem:[%s966_s28 + $0x40] sm:$0xff] }
  0x13   : > { %834 = vmatpush3.msra.mxu0 %v205_v3  ;;  %893 = vmatpush3.msra.mxu1 %v205_v3  ;;  %v194_v18 = vld [vmem:[%s966_s28 + $0xb0] sm:$0xff]  ;;  %v195_v20 = vld [vmem:[%s966_s28 + $0xb8] sm:$0xff]  ;;  %v196_v22 = vld [vmem:[%s966_s28 + $0xc0] sm:$0xff] }
  0x14   : > { %835 = vmatprep.subr.mxu0 %v204_v4  ;;  %889 = vmatprep.subr.mxu1 %v204_v4  ;;  %v181_v23 = vld [vmem:[%s966_s28 + $0x48] sm:$0xff]  ;;  %v182_v25 = vld [vmem:[%s966_s28 + $0x50] sm:$0xff]  ;;  %v183_v27 = vld [vmem:[%s966_s28 + $0x58] sm:$0xff] }
  0x15   : > { %836 = vmatpush3.msra.mxu0 %v204_v4  ;;  %894 = vmatpush3.msra.mxu1 %v204_v4  ;;  %v197_v24 = vld [vmem:[%s966_s28 + $0xc8] sm:$0xff]  ;;  %v198_v26 = vld [vmem:[%s966_s28 + $0xd0] sm:$0xff]  ;;  %v199_v28 = vld [vmem:[%s966_s28 + $0xd8] sm:$0xff] }
  0x16   : > { %837 = vmatprep.mubr.msk.f32.mxu0 %vm209_vm1, %v172_v5  ;;  %861 = vmatprep.mubr.msk.f32.mxu1 %vm209_vm1, %v188_v6  ;;  %v184_v29 = vld [vmem:[%s966_s28 + $0x60] sm:$0xff]  ;;  %v185_v31 = vld [vmem:[%s966_s28 + $0x68] sm:$0xff]  ;;  %v186_v33 = vld [vmem:[%s966_s28 + $0x70] sm:$0xff] }
  0x17   : > { %838 = vmatmul.mubr.msk.f32.vlgmr.msra.gmra.mxu0 %vm209_vm1, %v173_v7  ;;  %862 = vmatmul.mubr.msk.f32.vlgmr.msra.gmra.mxu1 %vm209_vm1, %v189_v8  ;;  %v200_v30 = vld [vmem:[%s966_s28 + $0xe0] sm:$0xff]  ;;  %v201_v32 = vld [vmem:[%s966_s28 + $0xe8] sm:$0xff]  ;;  %v202_v34 = vld [vmem:[%s966_s28 + $0xf0] sm:$0xff] }
  0x18   : > { %840 = vmatprep.mubr.msk.f32.mxu0 %vm209_vm1, %v174_v9  ;;  %864 = vmatprep.mubr.msk.f32.mxu1 %vm209_vm1, %v190_v10  ;;  %v187_v35 = vld [vmem:[%s966_s28 + $0x78] sm:$0xff] }
  0x19   : > { %v203_v36 = vld [vmem:[%s966_s28 + $0xf8] sm:$0xff] }
  0x1b   : > { %841 = vmatmul.mubr.msk.f32.gmra.mxu0 %vm209_vm1, %v175_v11  ;;  %865 = vmatmul.mubr.msk.f32.gmra.mxu1 %vm209_vm1, %v191_v12 }
  0x1c   : > { %843 = vmatprep.mubr.msk.f32.mxu0 %vm209_vm1, %v176_v13  ;;  %867 = vmatprep.mubr.msk.f32.mxu1 %vm209_vm1, %v192_v14 }
  0x1f   : > { %844 = vmatmul.mubr.msk.f32.gmra.mxu0 %vm209_vm1, %v177_v15  ;;  %868 = vmatmul.mubr.msk.f32.gmra.mxu1 %vm209_vm1, %v193_v16 }
  0x20   : > { %846 = vmatprep.mubr.msk.f32.mxu0 %vm209_vm1, %v178_v17  ;;  %870 = vmatprep.mubr.msk.f32.mxu1 %vm209_vm1, %v194_v18 }
  0x23   : > { %847 = vmatmul.mubr.msk.f32.gmra.mxu0 %vm209_vm1, %v179_v19  ;;  %871 = vmatmul.mubr.msk.f32.gmra.mxu1 %vm209_vm1, %v195_v20 }
  0x24   : > { %849 = vmatprep.mubr.msk.f32.mxu0 %vm209_vm1, %v180_v21  ;;  %873 = vmatprep.mubr.msk.f32.mxu1 %vm209_vm1, %v196_v22 }
  0x27   : > { %850 = vmatmul.mubr.msk.f32.gmra.mxu0 %vm209_vm1, %v181_v23  ;;  %874 = vmatmul.mubr.msk.f32.gmra.mxu1 %vm209_vm1, %v197_v24 }
  0x28   : > { %852 = vmatprep.mubr.msk.f32.mxu0 %vm209_vm1, %v182_v25  ;;  %876 = vmatprep.mubr.msk.f32.mxu1 %vm209_vm1, %v198_v26 }
  0x2b   : > { %853 = vmatmul.mubr.msk.f32.gmra.mxu0 %vm209_vm1, %v183_v27  ;;  %877 = vmatmul.mubr.msk.f32.gmra.mxu1 %vm209_vm1, %v199_v28 }
  0x2c   : > { %855 = vmatprep.mubr.msk.f32.mxu0 %vm209_vm1, %v184_v29  ;;  %879 = vmatprep.mubr.msk.f32.mxu1 %vm209_vm1, %v200_v30 }
  0x2f   : > { %856 = vmatmul.mubr.msk.f32.gmra.mxu0 %vm209_vm1, %v185_v31  ;;  %880 = vmatmul.mubr.msk.f32.gmra.mxu1 %vm209_vm1, %v201_v32 }
  0x30   : > { %858 = vmatprep.mubr.msk.f32.mxu0 %vm209_vm1, %v186_v33  ;;  %882 = vmatprep.mubr.msk.f32.mxu1 %vm209_vm1, %v202_v34 }
  0x33   : > { %859 = vmatmul.mubr.msk.f32.gmra.mxu0 %vm209_vm1, %v187_v35  ;;  %883 = vmatmul.mubr.msk.f32.gmra.mxu1 %vm209_vm1, %v203_v36 }
  0xd7   : > { %v1039_v37 = vpop.f32.mrf.mxu0  ;;  %v1041_v38 = vpop.f32.mrf.mxu1 }
  0xd8   : > { %536 = vst [vmem:[%s1037_s4 + $0x8] sm:$0xff] %v1039_v37  ;;  %552 = vst [vmem:[%s1037_s4 + $0x88] sm:$0xff] %v1041_v38 }
  0xd9   : > { %v1047_v39 = vpop.f32.mrf.mxu0  ;;  %v1049_v40 = vpop.f32.mrf.mxu1 }
  0xda   : > { %535 = vst [vmem:[%s1037_s4] sm:$0xff] %v1047_v39  ;;  %551 = vst [vmem:[%s1037_s4 + $0x80] sm:$0xff] %v1049_v40 }
  0xdb   : > { %v1055_v41 = vpop.f32.mrf.mxu0  ;;  %v1057_v42 = vpop.f32.mrf.mxu1 }
  0xdc   : > { %538 = vst [vmem:[%s1037_s4 + $0x18] sm:$0xff] %v1055_v41  ;;  %554 = vst [vmem:[%s1037_s4 + $0x98] sm:$0xff] %v1057_v42 }
  0xdd   : > { %v1063_v43 = vpop.f32.mrf.mxu0  ;;  %v1065_v44 = vpop.f32.mrf.mxu1 }
  0xde   : > { %537 = vst [vmem:[%s1037_s4 + $0x10] sm:$0xff] %v1063_v43  ;;  %553 = vst [vmem:[%s1037_s4 + $0x90] sm:$0xff] %v1065_v44 }
  0xdf   : > { %v1071_v45 = vpop.f32.mrf.mxu0  ;;  %v1073_v46 = vpop.f32.mrf.mxu1 }
  0xe0   : > { %540 = vst [vmem:[%s1037_s4 + $0x28] sm:$0xff] %v1071_v45  ;;  %556 = vst [vmem:[%s1037_s4 + $0xa8] sm:$0xff] %v1073_v46 }
  0xe1   : > { %v396_v47 = vpop.f32.mrf.mxu0  ;;  %v1079_v48 = vpop.f32.mrf.mxu1 }
  0xe2   : > { %539 = vst [vmem:[%s1037_s4 + $0x20] sm:$0xff] %v396_v47  ;;  %555 = vst [vmem:[%s1037_s4 + $0xa0] sm:$0xff] %v1079_v48 }
  0xe3   : > { %v1084_v49 = vpop.f32.mrf.mxu0  ;;  %v1086_v50 = vpop.f32.mrf.mxu1 }
  0xe4   : > { %542 = vst [vmem:[%s1037_s4 + $0x38] sm:$0xff] %v1084_v49  ;;  %558 = vst [vmem:[%s1037_s4 + $0xb8] sm:$0xff] %v1086_v50 }
  0xe5   : > { %v406_v51 = vpop.f32.mrf.mxu0  ;;  %v1092_v52 = vpop.f32.mrf.mxu1 }
  0xe6   : > { %541 = vst [vmem:[%s1037_s4 + $0x30] sm:$0xff] %v406_v51  ;;  %557 = vst [vmem:[%s1037_s4 + $0xb0] sm:$0xff] %v1092_v52 }
  0xe7   : > { %v1097_v53 = vpop.f32.mrf.mxu0  ;;  %v1099_v54 = vpop.f32.mrf.mxu1 }
  0xe8   : > { %544 = vst [vmem:[%s1037_s4 + $0x48] sm:$0xff] %v1097_v53  ;;  %560 = vst [vmem:[%s1037_s4 + $0xc8] sm:$0xff] %v1099_v54 }
  0xe9   : > { %v416_v55 = vpop.f32.mrf.mxu0  ;;  %v1105_v56 = vpop.f32.mrf.mxu1 }
  0xea   : > { %543 = vst [vmem:[%s1037_s4 + $0x40] sm:$0xff] %v416_v55  ;;  %559 = vst [vmem:[%s1037_s4 + $0xc0] sm:$0xff] %v1105_v56 }
  0xeb   : > { %v854_v57 = vpop.f32.mrf.mxu0  ;;  %v1110_v58 = vpop.f32.mrf.mxu1 }
  0xec   : > { %546 = vst [vmem:[%s1037_s4 + $0x58] sm:$0xff] %v854_v57  ;;  %562 = vst [vmem:[%s1037_s4 + $0xd8] sm:$0xff] %v1110_v58 }
  0xed   : > { %v426_v59 = vpop.f32.mrf.mxu0  ;;  %v1115_v60 = vpop.f32.mrf.mxu1 }
  0xee   : > { %545 = vst [vmem:[%s1037_s4 + $0x50] sm:$0xff] %v426_v59  ;;  %561 = vst [vmem:[%s1037_s4 + $0xd0] sm:$0xff] %v1115_v60 }
  0xef   : > { %v857_v61 = vpop.f32.mrf.mxu0  ;;  %v1120_v62 = vpop.f32.mrf.mxu1 }
  0xf0   : > { %548 = vst [vmem:[%s1037_s4 + $0x68] sm:$0xff] %v857_v61  ;;  %564 = vst [vmem:[%s1037_s4 + $0xe8] sm:$0xff] %v1120_v62 }
  0xf1   : > { %v436_v63 = vpop.f32.mrf.mxu0  ;;  %v1125_v0 = vpop.f32.mrf.mxu1 }
  0xf2   : > { %547 = vst [vmem:[%s1037_s4 + $0x60] sm:$0xff] %v436_v63  ;;  %563 = vst [vmem:[%s1037_s4 + $0xe0] sm:$0xff] %v1125_v0  ;;  %570 = sbr.rel (%p787_p4) target bundleno = 249 (0xf9), region = 32 }
  0xf3   : > { %v860_v1 = vpop.f32.mrf.mxu0  ;;  %v1130_v2 = vpop.f32.mrf.mxu1 }
  0xf4   : > { %550 = vst [vmem:[%s1037_s4 + $0x78] sm:$0xff] %v860_v1  ;;  %566 = vst [vmem:[%s1037_s4 + $0xf8] sm:$0xff] %v1130_v2 }
  0xf5   : > { %v446_v3 = vpop.f32.mrf.mxu0  ;;  %v1135_v4 = vpop.f32.mrf.mxu1 }
  0xf6   : > { %549 = vst [vmem:[%s1037_s4 + $0x70] sm:$0xff] %v446_v3  ;;  %565 = vst [vmem:[%s1037_s4 + $0xf0] sm:$0xff] %v1135_v4 }
  0xf7   : > { %v912_v5 = vmov 0.0  }
  0xf8   : > { %571 = vst [vmem:[%s1226_s3] sm:$0x3] %v912_v5 }
  0xf9 PF: > { %v572_v6 = vadd.f32 %v1039_v37, %v1047_v39  ;;  %v609_v9 = vmul.f32 %v1047_v39, %v1047_v39  ;;  %v610_v10 = vmul.f32 %v1039_v37, %v1039_v37  ;;  %v611_v12 = vmul.f32 %v1063_v43, %v1063_v43 }
  0xfa   : > { %v612_v14 = vmul.f32 %v1055_v41, %v1055_v41  ;;  %v613_v17 = vmul.f32 %v396_v47, %v396_v47  ;;  %v614_v20 = vmul.f32 %v1071_v45, %v1071_v45  ;;  %v615_v23 = vmul.f32 %v406_v51, %v406_v51 }
  0xfb   : > { %v573_v7 = vadd.f32 %v572_v6, %v1063_v43  ;;  %v641_v15 = vadd.f32 %v610_v10, %v609_v9  ;;  %v616_v26 = vmul.f32 %v1084_v49, %v1084_v49  ;;  %v617_v29 = vmul.f32 %v416_v55, %v416_v55 }
  0xfc   : > { %v618_v32 = vmul.f32 %v1097_v53, %v1097_v53  ;;  %v619_v35 = vmul.f32 %v426_v59, %v426_v59  ;;  %v620_v39 = vmul.f32 %v854_v57, %v854_v57  ;;  %v623_v6 = vmul.f32 %v446_v3, %v446_v3 }
  0xfd   : > { %v574_v8 = vadd.f32 %v1055_v41, %v573_v7  ;;  %v642_v18 = vadd.f32 %v641_v15, %v611_v12  ;;  %vm679_vm2 = vcmask 1040384  }
  0xff   : > { %v575_v11 = vadd.f32 %v574_v8, %v396_v47  ;;  %v643_v21 = vadd.f32 %v642_v18, %v612_v14  ;;  %v628_v14 = vmul.f32 %v1057_v42, %v1057_v42  ;;  %v630_v18 = vmul.f32 %v1073_v46, %v1073_v46 }
 0x101   : > { %v576_v13 = vadd.f32 %v1071_v45, %v575_v11  ;;  %v644_v24 = vadd.f32 %v643_v21, %v613_v17  ;;  %v621_v45 = vmul.f32 %v436_v63, %v436_v63 }
 0x103   : > { %v577_v16 = vadd.f32 %v576_v13, %v406_v51  ;;  %v645_v27 = vadd.f32 %v644_v24, %v614_v20  ;;  %v631_v20 = vmul.f32 %v1092_v52, %v1092_v52  ;;  %v633_v24 = vmul.f32 %v1105_v56, %v1105_v56 }
 0x105   : > { %v578_v19 = vadd.f32 %v1084_v49, %v577_v16  ;;  %v646_v30 = vadd.f32 %v645_v27, %v615_v23  ;;  %v622_v49 = vmul.f32 %v857_v61, %v857_v61  ;;  %v629_v16 = vmul.f32 %v1079_v48, %v1079_v48 }
 0x107   : > { %v579_v22 = vadd.f32 %v578_v19, %v416_v55  ;;  %v647_v33 = vadd.f32 %v646_v30, %v616_v26  ;;  %v634_v26 = vmul.f32 %v1099_v54, %v1099_v54  ;;  %v636_v30 = vmul.f32 %v1110_v58, %v1110_v58 }
 0x109   : > { %v580_v25 = vadd.f32 %v1097_v53, %v579_v22  ;;  %v648_v36 = vadd.f32 %v647_v33, %v617_v29  ;;  %v624_v53 = vmul.f32 %v860_v1, %v860_v1  ;;  %v632_v22 = vmul.f32 %v1086_v50, %v1086_v50 }
 0x10b   : > { %v581_v28 = vadd.f32 %v580_v25, %v426_v59  ;;  %v649_v41 = vadd.f32 %v648_v36, %v618_v32  ;;  %v637_v32 = vmul.f32 %v1125_v0, %v1125_v0  ;;  %v639_v36 = vmul.f32 %v1135_v4, %v1135_v4 }
 0x10d   : > { %v582_v31 = vadd.f32 %v854_v57, %v581_v28  ;;  %v650_v47 = vadd.f32 %v649_v41, %v619_v35  ;;  %v625_v57 = vmul.f32 %v1049_v40, %v1049_v40  ;;  %v635_v28 = vmul.f32 %v1115_v60, %v1115_v60 }
 0x10f   : > { %v583_v34 = vadd.f32 %v582_v31, %v436_v63  ;;  %v651_v5 = vadd.f32 %v650_v47, %v620_v39 }
 0x111   : > { %v584_v37 = vadd.f32 %v857_v61, %v583_v34  ;;  %v652_v7 = vadd.f32 %v651_v5, %v621_v45  ;;  %v626_v61 = vmul.f32 %v1041_v38, %v1041_v38  ;;  %v638_v34 = vmul.f32 %v1120_v62, %v1120_v62 }
 0x113   : > { %v585_v43 = vadd.f32 %v584_v37, %v446_v3  ;;  %v653_v9 = vadd.f32 %v652_v7, %v622_v49  ;;  %v627_v3 = vmul.f32 %v1065_v44, %v1065_v44 }
 0x115   : > { %v586_v51 = vadd.f32 %v860_v1, %v585_v43  ;;  %v654_v10 = vadd.f32 %v653_v9, %v623_v6 }
 0x117   : > { %v587_v55 = vadd.f32 %v586_v51, %v1049_v40  ;;  %v655_v11 = vadd.f32 %v654_v10, %v624_v53 }
 0x119   : > { %v588_v8 = vadd.f32 %v1041_v38, %v587_v55  ;;  %v656_v13 = vadd.f32 %v655_v11, %v625_v57 }
 0x11b   : > { %v589_v59 = vadd.f32 %v588_v8, %v1065_v44  ;;  %v657_v15 = vadd.f32 %v656_v13, %v626_v61 }
 0x11d   : > { %v590_v63 = vadd.f32 %v1057_v42, %v589_v59  ;;  %v658_v17 = vadd.f32 %v657_v15, %v627_v3 }
 0x11f   : > { %v591_v12 = vadd.f32 %v590_v63, %v1079_v48  ;;  %v659_v19 = vadd.f32 %v658_v17, %v628_v14 }
 0x121   : > { %v592_v1 = vadd.f32 %v1073_v46, %v591_v12  ;;  %v660_v21 = vadd.f32 %v659_v19, %v629_v16 }
 0x123   : > { %v593_v40 = vadd.f32 %v592_v1, %v1092_v52  ;;  %v661_v23 = vadd.f32 %v660_v21, %v630_v18 }
 0x125   : > { %v594_v38 = vadd.f32 %v1086_v50, %v593_v40  ;;  %v662_v25 = vadd.f32 %v661_v23, %v631_v20 }
 0x127   : > { %v595_v44 = vadd.f32 %v594_v38, %v1105_v56  ;;  %v663_v27 = vadd.f32 %v662_v25, %v632_v22 }
 0x129   : > { %v596_v42 = vadd.f32 %v1099_v54, %v595_v44  ;;  %v664_v29 = vadd.f32 %v663_v27, %v633_v24 }
 0x12b   : > { %v597_v48 = vadd.f32 %v596_v42, %v1115_v60  ;;  %v665_v31 = vadd.f32 %v664_v29, %v634_v26 }
 0x12d   : > { %v598_v46 = vadd.f32 %v1110_v58, %v597_v48  ;;  %v666_v33 = vadd.f32 %v665_v31, %v635_v28  ;;  %v640_v58 = vmul.f32 %v1130_v2, %v1130_v2 }
 0x12f   : > { %v599_v52 = vadd.f32 %v598_v46, %v1125_v0  ;;  %v667_v35 = vadd.f32 %v666_v33, %v636_v30 }
 0x131   : > { %v600_v50 = vadd.f32 %v1120_v62, %v599_v52  ;;  %v668_v37 = vadd.f32 %v667_v35, %v637_v32 }
 0x133   : > { %v601_v56 = vadd.f32 %v600_v50, %v1135_v4  ;;  %v669_v41 = vadd.f32 %v668_v37, %v638_v34  ;;  %v678_v4 = vld [vmem:[%s1226_s3] sm:$0x3] }
 0x135   : > { %v602_v54 = vadd.f32 %v1130_v2, %v601_v56  ;;  %v670_v45 = vadd.f32 %v669_v41, %v639_v36 }
 0x137   : > { %v603_v60 = vrot.slane %v602_v54, 4  ;;  %v671_v0 = vadd.f32 %v670_v45, %v640_v58 }
 0x139   : > { %v604_v39 = vadd.f32 %v603_v60, %v602_v54  ;;  %v672_v51 = vrot.slane %v671_v0, 4 }
 0x13b   : > { %v605_v43 = vrot.slane %v604_v39, 2  ;;  %v673_v49 = vadd.f32 %v672_v51, %v671_v0 }
 0x13d   : > { %v606_v47 = vadd.f32 %v605_v43, %v604_v39  ;;  %v674_v55 = vrot.slane %v673_v49, 2 }
 0x13f   : > { %v607_v5 = vrot.slane %v606_v47, 1  ;;  %v675_v62 = vadd.f32 %v674_v55, %v673_v49 }
 0x141   : > { %v608_v6 = vadd.f32 %v607_v5, %v606_v47  ;;  %v676_v7 = vrot.slane %v675_v62, 1 }
 0x143   : > { %v677_v8 = vadd.f32 %v676_v7, %v675_v62 }
 0x145   : > { %v680_v53 = vsel %vm679_vm2, %v608_v6, %v677_v8 }
 0x146   : > { %v681_v2 = vadd.f32 %v680_v53, %v678_v4 }
 0x148   : > { %682 = vst [vmem:[%s1226_s3] sm:$0x3] %v681_v2 }
 0x149 PF: > { %s14_s12 = sadd.s32 1, %s910_s12  }
 0x14a   : > { %p11_p5 = scmp.ge.s32.totalorder %s14_s12, 4  }
 0x14c   :  { %13 = sbr.rel (!%p11_p5) target bundleno = 1 (0x1), region = 70 }

</bundles_post_ra>
